<compile_context>
chip_gen: v7x
topology: tpu7x:2x2x1
jax: 0.10.0
libtpu: 0.0.40
codegen_flags: <defaults>
</compile_context>

<pallas_src>
import jax
import jax.numpy as jnp
from jax.experimental import pallas as pl
from jax.experimental.pallas import tpu as pltpu


def _round_up(x: int, m: int) -> int:
    return ((x + m - 1) // m) * m


def _bilinear_weight_matrix(out_size: int, in_size: int) -> jnp.ndarray:
    """W[o, i] such that (W @ x) is 1-D bilinear resize with half-pixel centers."""
    scale = in_size / out_size
    dst = jnp.arange(out_size, dtype=jnp.float32)
    src = (dst + 0.5) * scale - 0.5
    src = jnp.maximum(src, 0.0)                      # PyTorch clamps source index at 0
    lo = jnp.floor(src).astype(jnp.int32)
    lo = jnp.minimum(lo, in_size - 1)
    hi = jnp.minimum(lo + 1, in_size - 1)
    frac = src - lo.astype(jnp.float32)
    rows = jnp.arange(out_size)
    w = jnp.zeros((out_size, in_size), dtype=jnp.float32)
    w = w.at[rows, lo].add(1.0 - frac)
    w = w.at[rows, hi].add(frac)
    return w


def _make_resize_kernel(C: int, Hin: int, Win: int, height_first: bool):
    """Kernel over one batch element: x (1,C,Hin,Win) -> o (1,C,Hout,Wout_pad)."""

    def kernel(x_ref, wy_ref, wxT_ref, o_ref):
        wy = wy_ref[...]        # (Hout, Hin)       bf16
        wxT = wxT_ref[...]      # (Win, Wout_pad)   bf16, pre-transposed + lane-padded
        if height_first:
            # Per-channel: (Hout,Hin)@(Hin,Win) -> (Hout,Win)@(Win,Wout_pad)
            for c in range(C):
                xc = x_ref[0, c].astype(jnp.bfloat16)                       # (Hin, Win)
                t = jnp.dot(wy, xc, preferred_element_type=jnp.float32)     # (Hout, Win)
                o = jnp.dot(t.astype(jnp.bfloat16), wxT,
                            preferred_element_type=jnp.float32)             # (Hout, Wout_pad)
                o_ref[0, c] = o.astype(o_ref.dtype)
        else:
            # Folded width matmul across channels: (C*Hin, Win)@(Win, Wout_pad),
            # then per-channel height matmul (Hout,Hin)@(Hin,Wout_pad).
            x2d = x_ref[0].astype(jnp.bfloat16).reshape(C * Hin, Win)
            t = jnp.dot(x2d, wxT, preferred_element_type=jnp.float32)       # (C*Hin, Wout_pad)
            for c in range(C):
                tc = t[c * Hin:(c + 1) * Hin].astype(jnp.bfloat16)
                o = jnp.dot(wy, tc, preferred_element_type=jnp.float32)     # (Hout, Wout_pad)
                o_ref[0, c] = o.astype(o_ref.dtype)

    return kernel


def resize_preprocessor(imgs: jnp.ndarray, height: int, width: int):
    """Pallas equivalent of ResizePreProcessor.forward for a batched NCHW tensor.

    Returns (resized_imgs [B, C, height, width], original_sizes [B, 2]).
    """
    B, C, Hin, Win = imgs.shape
    Wout_pad = _round_up(width, 128)

    # Interpolation weights (trace-time setup). Wx is pre-transposed and its
    # output dim is zero-padded to a lane-dense multiple of 128.
    wy = _bilinear_weight_matrix(height, Hin).astype(jnp.bfloat16)          # (Hout, Hin)
    wx = _bilinear_weight_matrix(width, Win)                                # (Wout, Win)
    wxT = jnp.zeros((Win, Wout_pad), jnp.float32).at[:, :width].set(wx.T)
    wxT = wxT.astype(jnp.bfloat16)                                          # (Win, Wout_pad)

    # Static matmul-order choice from per-channel MXU FLOPs (padded lanes counted).
    flops_height_first = height * Win * (Hin + Wout_pad)
    flops_width_first = Hin * Wout_pad * (Win + height)
    height_first = flops_height_first <= flops_width_first

    kernel = _make_resize_kernel(C, Hin, Win, height_first)

    # VMEM budget: double-buffered in/out blocks + weights + in-kernel temps.
    itemsize = jnp.dtype(imgs.dtype).itemsize
    est = (2 * C * Hin * Win * itemsize
           + 2 * C * height * Wout_pad * itemsize
           + 2 * (height * Hin + Win * Wout_pad) * 2
           + 4 * C * (Hin + height) * max(Win, Wout_pad) * 4)
    vmem_limit = int(min(64 * 2**20, max(32 * 2**20, 2 * est)))
    # TODO(synk): for very large images (est > ~64 MiB, e.g. 4K frames), tile along
    # Hout and window only the matching contiguous Hin rows + Wy row-block per step.

    resized_padded = pl.pallas_call(
        kernel,
        out_shape=jax.ShapeDtypeStruct((B, C, height, Wout_pad), imgs.dtype),
        grid_spec=pltpu.PrefetchScalarGridSpec(
            num_scalar_prefetch=0,
            grid=(B,),
            in_specs=[
                pl.BlockSpec((1, C, Hin, Win), lambda b: (b, 0, 0, 0)),
                pl.BlockSpec((height, Hin), lambda b: (0, 0)),
                pl.BlockSpec((Win, Wout_pad), lambda b: (0, 0)),
            ],
            out_specs=pl.BlockSpec((1, C, height, Wout_pad),
                                   lambda b: (b, 0, 0, 0)),
        ),
        compiler_params=pltpu.CompilerParams(
            dimension_semantics=("parallel",),
            vmem_limit_bytes=vmem_limit),
    )(imgs, wy, wxT)

    resized = resized_padded if Wout_pad == width else resized_padded[..., :width]

    # original_sizes: imgs[0].new_zeros((B, 2)) filled with (H, W) -> imgs dtype
    # (mirrors PyTorch new_zeros semantics; int32 would be safer for indexing).
    original_sizes = jnp.tile(
        jnp.array([Hin, Win], dtype=imgs.dtype)[None, :], (B, 1))
    return resized, original_sizes


if __name__ == "__main__":
    key = jax.random.PRNGKey(0)
    B, C, Hin, Win = 2, 4, 16, 16
    Hout, Wout = 8, 8
    imgs = jax.random.normal(key, (B, C, Hin, Win), dtype=jnp.float32)

    resized, orig_sizes = resize_preprocessor(imgs, Hout, Wout)
    resized = jax.block_until_ready(resized)
    orig_sizes = jax.block_until_ready(orig_sizes)

    assert resized.shape == (B, C, Hout, Wout)
    assert orig_sizes.shape == (B, 2)
    assert bool(jnp.all(jnp.isfinite(resized)))
    assert bool(jnp.all(orig_sizes == jnp.array([[Hin, Win], [Hin, Win]], jnp.float32)))

    # Sanity: bilinear weights sum to 1, so resizing a constant image is (nearly)
    # exact even with bf16 weights + f32 accumulation.
    const_imgs = jnp.full((B, C, Hin, Win), 1.0, dtype=jnp.float32)
    const_out, _ = resize_preprocessor(const_imgs, Hout, Wout)
    const_out = jax.block_until_ready(const_out)
    assert bool(jnp.all(jnp.abs(const_out - 1.0) < 1e-2))

    print("KERNEL_OK")
</pallas_src>

<mosaic_0001>
module attributes {stable_mosaic.version = 11 : i64} {
  func.func @kernel(%arg0: i32, %arg1: memref<1x4x16x16xf32, #tpu.memory_space<vmem>>, %arg2: memref<8x16xbf16, #tpu.memory_space<vmem>>, %arg3: memref<16x128xbf16, #tpu.memory_space<vmem>>, %arg4: memref<1x4x8x128xf32, #tpu.memory_space<vmem>>) attributes {dimension_semantics = [#tpu.dimension_semantics<parallel>], iteration_bounds = array<i64: 2>, scalar_prefetch = 0 : i64, scratch_operands = 0 : i64, tpu.core_type = #tpu.core_type<tc>, window_params = [{transform_indices = @transform_0, window_bounds = array<i64: 1, 4, 16, 16>}, {pipeline_mode = #tpu.pipeline_mode<synchronous>, transform_indices = @transform_1, window_bounds = array<i64: 8, 16>}, {pipeline_mode = #tpu.pipeline_mode<synchronous>, transform_indices = @transform_2, window_bounds = array<i64: 16, 128>}, {transform_indices = @transform_3, window_bounds = array<i64: 1, 4, 8, 128>}]} {
    %c0 = arith.constant 0 : index
    %c0_0 = arith.constant 0 : index
    %0 = vector.load %arg2[%c0, %c0_0] : memref<8x16xbf16, #tpu.memory_space<vmem>>, vector<8x16xbf16>
    %c0_1 = arith.constant 0 : index
    %c0_2 = arith.constant 0 : index
    %1 = vector.load %arg3[%c0_1, %c0_2] : memref<16x128xbf16, #tpu.memory_space<vmem>>, vector<16x128xbf16>
    %c0_3 = arith.constant 0 : index
    %c0_4 = arith.constant 0 : index
    %c0_5 = arith.constant 0 : index
    %c0_6 = arith.constant 0 : index
    %2 = vector.load %arg1[%c0_3, %c0_4, %c0_5, %c0_6] : memref<1x4x16x16xf32, #tpu.memory_space<vmem>>, vector<1x1x16x16xf32>
    %3 = vector.shape_cast %2 : vector<1x1x16x16xf32> to vector<16x16xf32>
    %4 = arith.truncf %3 : vector<16x16xf32> to vector<16x16xbf16>
    %cst = arith.constant dense<0.000000e+00> : vector<8x16xf32>
    %5 = tpu.matmul %0, %4, %cst {dimension_numbers = #tpu.dot_dimension_numbers<[1], [0], [0], [1], [0, 0, 1, 1], [], []>} : vector<8x16xbf16>, vector<16x16xbf16>, vector<8x16xf32> -> vector<8x16xf32>
    %6 = arith.truncf %5 : vector<8x16xf32> to vector<8x16xbf16>
    %cst_7 = arith.constant dense<0.000000e+00> : vector<8x128xf32>
    %7 = tpu.matmul %6, %1, %cst_7 {dimension_numbers = #tpu.dot_dimension_numbers<[1], [0], [0], [1], [0, 0, 1, 1], [], []>} : vector<8x16xbf16>, vector<16x128xbf16>, vector<8x128xf32> -> vector<8x128xf32>
    %c0_8 = arith.constant 0 : index
    %c0_9 = arith.constant 0 : index
    %c0_10 = arith.constant 0 : index
    %c0_11 = arith.constant 0 : index
    %8 = vector.load %arg4[%c0_8, %c0_9, %c0_10, %c0_11] : memref<1x4x8x128xf32, #tpu.memory_space<vmem>>, vector<1x1x8x128xf32>
    %9 = vector.shape_cast %8 : vector<1x1x8x128xf32> to vector<8x128xf32>
    %10 = vector.shape_cast %7 : vector<8x128xf32> to vector<1x1x8x128xf32>
    tpu.vector_store %arg4[%c0_8, %c0_9, %c0_10, %c0_11], %10 {strides = array<i32>} : memref<1x4x8x128xf32, #tpu.memory_space<vmem>>, vector<1x1x8x128xf32>,
    %c0_12 = arith.constant 0 : index
    %c1 = arith.constant 1 : index
    %c0_13 = arith.constant 0 : index
    %c0_14 = arith.constant 0 : index
    %11 = vector.load %arg1[%c0_12, %c1, %c0_13, %c0_14] : memref<1x4x16x16xf32, #tpu.memory_space<vmem>>, vector<1x1x16x16xf32>
    %12 = vector.shape_cast %11 : vector<1x1x16x16xf32> to vector<16x16xf32>
    %13 = arith.truncf %12 : vector<16x16xf32> to vector<16x16xbf16>
    %cst_15 = arith.constant dense<0.000000e+00> : vector<8x16xf32>
    %14 = tpu.matmul %0, %13, %cst_15 {dimension_numbers = #tpu.dot_dimension_numbers<[1], [0], [0], [1], [0, 0, 1, 1], [], []>} : vector<8x16xbf16>, vector<16x16xbf16>, vector<8x16xf32> -> vector<8x16xf32>
    %15 = arith.truncf %14 : vector<8x16xf32> to vector<8x16xbf16>
    %cst_16 = arith.constant dense<0.000000e+00> : vector<8x128xf32>
    %16 = tpu.matmul %15, %1, %cst_16 {dimension_numbers = #tpu.dot_dimension_numbers<[1], [0], [0], [1], [0, 0, 1, 1], [], []>} : vector<8x16xbf16>, vector<16x128xbf16>, vector<8x128xf32> -> vector<8x128xf32>
    %c0_17 = arith.constant 0 : index
    %c1_18 = arith.constant 1 : index
    %c0_19 = arith.constant 0 : index
    %c0_20 = arith.constant 0 : index
    %17 = vector.load %arg4[%c0_17, %c1_18, %c0_19, %c0_20] : memref<1x4x8x128xf32, #tpu.memory_space<vmem>>, vector<1x1x8x128xf32>
    %18 = vector.shape_cast %17 : vector<1x1x8x128xf32> to vector<8x128xf32>
    %19 = vector.shape_cast %16 : vector<8x128xf32> to vector<1x1x8x128xf32>
    tpu.vector_store %arg4[%c0_17, %c1_18, %c0_19, %c0_20], %19 {strides = array<i32>} : memref<1x4x8x128xf32, #tpu.memory_space<vmem>>, vector<1x1x8x128xf32>,
    %c0_21 = arith.constant 0 : index
    %c2 = arith.constant 2 : index
    %c0_22 = arith.constant 0 : index
    %c0_23 = arith.constant 0 : index
    %20 = vector.load %arg1[%c0_21, %c2, %c0_22, %c0_23] : memref<1x4x16x16xf32, #tpu.memory_space<vmem>>, vector<1x1x16x16xf32>
    %21 = vector.shape_cast %20 : vector<1x1x16x16xf32> to vector<16x16xf32>
    %22 = arith.truncf %21 : vector<16x16xf32> to vector<16x16xbf16>
    %cst_24 = arith.constant dense<0.000000e+00> : vector<8x16xf32>
    %23 = tpu.matmul %0, %22, %cst_24 {dimension_numbers = #tpu.dot_dimension_numbers<[1], [0], [0], [1], [0, 0, 1, 1], [], []>} : vector<8x16xbf16>, vector<16x16xbf16>, vector<8x16xf32> -> vector<8x16xf32>
    %24 = arith.truncf %23 : vector<8x16xf32> to vector<8x16xbf16>
    %cst_25 = arith.constant dense<0.000000e+00> : vector<8x128xf32>
    %25 = tpu.matmul %24, %1, %cst_25 {dimension_numbers = #tpu.dot_dimension_numbers<[1], [0], [0], [1], [0, 0, 1, 1], [], []>} : vector<8x16xbf16>, vector<16x128xbf16>, vector<8x128xf32> -> vector<8x128xf32>
    %c0_26 = arith.constant 0 : index
    %c2_27 = arith.constant 2 : index
    %c0_28 = arith.constant 0 : index
    %c0_29 = arith.constant 0 : index
    %26 = vector.load %arg4[%c0_26, %c2_27, %c0_28, %c0_29] : memref<1x4x8x128xf32, #tpu.memory_space<vmem>>, vector<1x1x8x128xf32>
    %27 = vector.shape_cast %26 : vector<1x1x8x128xf32> to vector<8x128xf32>
    %28 = vector.shape_cast %25 : vector<8x128xf32> to vector<1x1x8x128xf32>
    tpu.vector_store %arg4[%c0_26, %c2_27, %c0_28, %c0_29], %28 {strides = array<i32>} : memref<1x4x8x128xf32, #tpu.memory_space<vmem>>, vector<1x1x8x128xf32>,
    %c0_30 = arith.constant 0 : index
    %c3 = arith.constant 3 : index
    %c0_31 = arith.constant 0 : index
    %c0_32 = arith.constant 0 : index
    %29 = vector.load %arg1[%c0_30, %c3, %c0_31, %c0_32] : memref<1x4x16x16xf32, #tpu.memory_space<vmem>>, vector<1x1x16x16xf32>
    %30 = vector.shape_cast %29 : vector<1x1x16x16xf32> to vector<16x16xf32>
    %31 = arith.truncf %30 : vector<16x16xf32> to vector<16x16xbf16>
    %cst_33 = arith.constant dense<0.000000e+00> : vector<8x16xf32>
    %32 = tpu.matmul %0, %31, %cst_33 {dimension_numbers = #tpu.dot_dimension_numbers<[1], [0], [0], [1], [0, 0, 1, 1], [], []>} : vector<8x16xbf16>, vector<16x16xbf16>, vector<8x16xf32> -> vector<8x16xf32>
    %33 = arith.truncf %32 : vector<8x16xf32> to vector<8x16xbf16>
    %cst_34 = arith.constant dense<0.000000e+00> : vector<8x128xf32>
    %34 = tpu.matmul %33, %1, %cst_34 {dimension_numbers = #tpu.dot_dimension_numbers<[1], [0], [0], [1], [0, 0, 1, 1], [], []>} : vector<8x16xbf16>, vector<16x128xbf16>, vector<8x128xf32> -> vector<8x128xf32>
    %c0_35 = arith.constant 0 : index
    %c3_36 = arith.constant 3 : index
    %c0_37 = arith.constant 0 : index
    %c0_38 = arith.constant 0 : index
    %35 = vector.load %arg4[%c0_35, %c3_36, %c0_37, %c0_38] : memref<1x4x8x128xf32, #tpu.memory_space<vmem>>, vector<1x1x8x128xf32>
    %36 = vector.shape_cast %35 : vector<1x1x8x128xf32> to vector<8x128xf32>
    %37 = vector.shape_cast %34 : vector<8x128xf32> to vector<1x1x8x128xf32>
    tpu.vector_store %arg4[%c0_35, %c3_36, %c0_37, %c0_38], %37 {strides = array<i32>} : memref<1x4x8x128xf32, #tpu.memory_space<vmem>>, vector<1x1x8x128xf32>,
    return
  }
  func.func @transform_0(%arg0: i32) -> (i32, i32, i32, i32) {
    %c0_i32 = arith.constant 0 : i32
    %c0_i32_0 = arith.constant 0 : i32
    %c0_i32_1 = arith.constant 0 : i32
    %c0_i32_2 = arith.constant 0 : i32
    return %arg0, %c0_i32, %c0_i32_0, %c0_i32_1 : i32, i32, i32, i32
  }
  func.func @transform_1(%arg0: i32) -> (i32, i32) {
    %c0_i32 = arith.constant 0 : i32
    %c0_i32_0 = arith.constant 0 : i32
    %c0_i32_1 = arith.constant 0 : i32
    return %c0_i32, %c0_i32_0 : i32, i32
  }
  func.func @transform_2(%arg0: i32) -> (i32, i32) {
    %c0_i32 = arith.constant 0 : i32
    %c0_i32_0 = arith.constant 0 : i32
    %c0_i32_1 = arith.constant 0 : i32
    return %c0_i32, %c0_i32_0 : i32, i32
  }
  func.func @transform_3(%arg0: i32) -> (i32, i32, i32, i32) {
    %c0_i32 = arith.constant 0 : i32
    %c0_i32_0 = arith.constant 0 : i32
    %c0_i32_1 = arith.constant 0 : i32
    %c0_i32_2 = arith.constant 0 : i32
    return %arg0, %c0_i32, %c0_i32_0, %c0_i32_1 : i32, i32, i32, i32
  }
}

</mosaic_0001>

<bundles_post_ra>
// kernel: tpu_custom_call.1
= control target key start
LH: loop header
LB: loop body
LE: loop exit
PB: predicated region body
PF: predicated region fallthrough
CT: control target
= control target key end

     0   :  { %8 = vsyncpa [#allocation3], 0  ;;  %s1320_s0 = inlined_call_operand.hbm [shape: f32[2,4,16,16], index: 0, kind: input, shape index: {}]   ;;  %s1321_s1 = inlined_call_operand.hbm [shape: bf16[8,16], index: 1, kind: input, shape index: {}]   ;;  %s1322_s2 = inlined_call_operand.hbm [shape: bf16[16,128], index: 2, kind: input, shape index: {}]   ;;  %s1323_s3 = inlined_call_operand.hbm [shape: f32[2,4,8,128], index: 3, kind: output, shape index: {}]  }
   0x1   :  { %10 = vsyncpa [#allocation3 + $0x1], 0 }
   0x2   :  { %11 = vsyncpa [#allocation6], 0 }
   0x3   :  { %12 = vsyncpa [#allocation4], 0 }
   0x4   :  { %14 = vsyncpa [#allocation4 + $0x1], 0  ;;  %s1062_s12 = smov 0   ;;  %s1064_s13 = smov 0  }
   0x5   :  { %s1066_s14 = smov 0   ;;  %s1068_s15 = smov 0  }
   0x6 LB: > { %s1083_s16 = sadd.s32 4294967295, %s1028_s15   ;;  %s694_s17 = sadd.s32 4294967294, %s1028_s15   ;;  %s1028_s15 = sphi %s1068_s15, %s1348_s15   ;;  %s1024_s14 = sphi %s1066_s14, %s1347_s14   ;;  %s1020_s13 = sphi %s1064_s13, %s1346_s13   ;;  %s1016_s12 = sphi %s1062_s12, %s1345_s12  }
   0x7   : > { %s1087_s18 = sadd.s32 1, %s1028_s15   ;;  %s27_s19 = sadd.s32 1, %s1024_s14 }
   0x8   : > { %s24_s20 = ssub.s32 %s1028_s15, %s1087_s18  ;;  %p34_p0 = scmp.ne.s32.totalorder %s1024_s14, %s1020_s13 }
   0x9   : > { %p25_p1 = scmp.eq.s32.totalorder %s24_s20, 0  ;;  %p35_p2 = scmp.eq.s32.totalorder %s1028_s15, 0 }
   0xa   : > { %p40_p3 = scmp.ne.s32.totalorder %s1020_s13, %s1016_s12  ;;  %p1324_p4 = scmp.eq.s32.totalorder %s1083_s16, 0 }
   0xb   : > { %s1099_s21 = scalar_select %p25_p1, %s1024_s14, %s27_s19  }
   0xc   : > { %p1101_p5 = por %p35_p2, %p34_p0  ;;  %p1107_p6 = por %p1324_p4, %p40_p3 }
   0xd   : > { %p106_p7 = scmp.eq.s32.totalorder %s1083_s16, 1  ;;  %p112_p8 = scmp.eq.s32.totalorder %s694_s17, 1 }
   0xe   : > { %s1330_s23 = scalar_select %p1107_p6, 1, 0 }
   0xf   : > { %p695_p9 = scmp.ge.s32.totalorder %s1028_s15, 1  ;;  %p119_p10 = scmp.lt.s32.totalorder %s1028_s15, 3 }
  0x10   : > { %p1114_p11 = por %p106_p7, %p34_p0  ;;  %p1118_p12 = por %p112_p8, %p40_p3 }
  0x11   : > { %p1122_p13 = pnand %p695_p9, %p119_p10  ;;  %s1030_s27 = smov [#allocation5]  }
  0x12   : > { %s1331_s24 = scalar_select %p1114_p11, 1, 0 }
  0x13   : > { %s1332_s25 = scalar_select %p1118_p12, 1, 0 }
  0x14   : > { %s1333_s26 = scalar_select %p1122_p13, 1, 0 }
  0x15   : > { %p808_p2 = pneg %p1122_p13  ;;  %s132_s28 = sshll.u32 %s1030_s27, 4  ;;  %s133_s28 = int_to_ptr.vmem [resolvable:$true] %s132_s28 }
  0x16   : > { %p825_p4 = scmp.lt.s32.totalorder %s1028_s15, 2  ;;  %p1334_p0 = scmp.eq.s32.totalorder %s1083_s16, 0 }
  0x17   : > { %s1031_s4 = smov [#allocation7]   ;;  %s872_s8 = scalar_lea.hbm %s1321_s1, 64 }
  0x18   : > { %p1132_p7 = pnand %p808_p2, %p1334_p0  ;;  %p1138_p3 = pnand %p825_p4, %p1101_p5 }
  0x19   : > { %s142_s5 = sshll.u32 %s1031_s4, 4  ;;  %p873_p8 = scmp.ne.s32.totalorder %s1321_s1, %s872_s8  ;;  %s1142_s5 = int_to_ptr.vmem [resolvable:$true] %s142_s5 }
  0x1a   : > { %s1336_s30 = scalar_select %p1138_p3, 1, 0 }
  0x1b   : > { %p874_p9 = pneg %p1132_p7  ;;  %p879_p10 = scmp.lt.u32.totalorder %s872_s8, %s1321_s1 }
  0x1d   : > { %p875_p4 = pnand %p874_p9, %p873_p8 }
  0x1f   : > { %p876_p5 = pneg %p875_p4 }
  0x21   : > { %p881_p2 = pnand %p879_p10, %p876_p5 }
  0x23   : > { %884 = shalt.err (!%p881_p2)
}
  0x24   : > { %s885_s19 = scalar_lea.vmem %s133_s28, 64  ;;  %p893_p11 = scmp.lt.s32.totalorder %s133_s28, %s133_s28 }
  0x25   : > { %p886_p0 = scmp.ne.s32.totalorder %s133_s28, %s885_s19  ;;  %p894_p6 = scmp.lt.s32.totalorder %s885_s19, %s885_s19 }
  0x27   : > { %p888_p1 = pnand %p886_p0, %p874_p9  ;;  %p895_p13 = por %p894_p6, %p893_p11 }
  0x29   : > { %p889_p12 = pneg %p888_p1 }
  0x2b   : > { %p896_p3 = pnand %p895_p13, %p889_p12 }
  0x2d   : > { %899 = shalt.err (!%p896_p3)
}
  0x2e   : > { %811 = dma.hbm_to_vmem [thread:$0]  (!%p1132_p7), %s1321_s1, 64, %s133_s28, [#allocation6]  }
  0x2f   : > { %s156_s27 = sand.u32 1, %s1024_s14   ;;  %s900_s7 = scalar_lea.hbm %s1322_s2, 128 }
  0x30   : > { %p901_p1 = scmp.ne.s32.totalorder %s1322_s2, %s900_s7  ;;  %p907_p12 = scmp.lt.u32.totalorder %s900_s7, %s1322_s2 }
  0x32   : > { %p903_p6 = pnand %p901_p1, %p874_p9 }
  0x34   : > { %p904_p11 = pneg %p903_p6 }
  0x36   : > { %p909_p13 = pnand %p907_p12, %p904_p11 }
  0x38   : > { %912 = shalt.err (!%p909_p13)
}
  0x39   : > { %s913_s28 = scalar_lea.vmem %s1142_s5, 128  ;;  %p921_p5 = scmp.lt.s32.totalorder %s1142_s5, %s1142_s5 }
  0x3a   : > { %p914_p3 = scmp.ne.s32.totalorder %s1142_s5, %s913_s28  ;;  %p922_p10 = scmp.lt.s32.totalorder %s913_s28, %s913_s28 }
  0x3c   : > { %p916_p8 = pnand %p914_p3, %p874_p9  ;;  %p923_p2 = por %p922_p10, %p921_p5 }
  0x3e   : > { %p917_p4 = pneg %p916_p8 }
  0x40   : > { %p924_p0 = pnand %p923_p2, %p917_p4 }
  0x42   : > { %927 = shalt.err (!%p924_p0)
}
  0x43   : > { %s1032_s17 = smov 64   ;;  %s1033_s19 = smov 4  }
  0x44   : > { %814 = dma.hbm_to_vmem [thread:$0]  (!%p1132_p7), %s1322_s2, 128, %s1142_s5, [#allocation6], %s1032_s17, %s1032_s17, %s1033_s19  }
  0x45   : > { %s699_s4 = sshll.u32 %s156_s27, 6  ;;  %s730_s6 = sshll.u32 %s1028_s15, 10 }
  0x46   : > { %s1196_s9 = scalar_lea.hbm %s1320_s0, %s730_s6  ;;  %s160_s10 = scalar_lea.vmem [#allocation2], %s699_s4 }
  0x47   : > { %s167_s11 = sshll.u32 %s160_s10, 4  ;;  %s1200_s29 = scalar_lea.sflag [#allocation3], %s156_s27  ;;  %s1198_s11 = int_to_ptr.vmem [resolvable:$true] %s167_s11 }
  0x48   : > { %s928_s28 = scalar_lea.hbm %s1196_s9, 1024  ;;  %p1337_p7 = scmp.ne.s32.totalorder %s1336_s30, 0 }
  0x49   : > { %p929_p9 = scmp.ne.s32.totalorder %s1196_s9, %s928_s28  ;;  %s933_s19 = scalar_lea.hbm %s1320_s0, 2048 }
  0x4a   : > { %p930_p1 = pneg %p1337_p7  ;;  %p934_p12 = scmp.lt.u32.totalorder %s1196_s9, %s1320_s0 }
  0x4b   : > { %p935_p13 = scmp.lt.u32.totalorder %s933_s19, %s928_s28  ;;  %p937_p8 = scmp.lt.u32.totalorder %s928_s28, %s1196_s9 }
  0x4c   : > { %p931_p6 = pnand %p930_p1, %p929_p9 }
  0x4d   : > { %p936_p3 = por %p935_p13, %p934_p12 }
  0x4e   : > { %p932_p11 = pneg %p931_p6 }
  0x4f   : > { %p938_p4 = por %p937_p8, %p936_p3 }
  0x51   : > { %p939_p5 = pnand %p938_p4, %p932_p11 }
  0x53   : > { %942 = shalt.err (!%p939_p5)
}
  0x54   : > { %s943_s27 = scalar_lea.vmem %s1198_s11, 1024  ;;  %s1034_s4 = smov [#allocation2]  }
  0x55   : > { %p944_p10 = scmp.ne.s32.totalorder %s1198_s11, %s943_s27  ;;  %s948_s6 = sshll.u32 %s1034_s4, 4  ;;  %s949_s6 = int_to_ptr.vmem [resolvable:$false] %s948_s6 }
  0x56   : > { %s950_s7 = scalar_lea.vmem %s949_s6, 2048  ;;  %p951_p9 = scmp.lt.s32.totalorder %s1198_s11, %s949_s6 }
  0x57   : > { %p946_p2 = pnand %p944_p10, %p930_p1  ;;  %p952_p6 = scmp.lt.s32.totalorder %s950_s7, %s943_s27 }
  0x59   : > { %p947_p0 = pneg %p946_p2  ;;  %p953_p12 = por %p952_p6, %p951_p9 }
  0x5b   : > { %p954_p13 = pnand %p953_p12, %p947_p0 }
  0x5d   : > { %957 = shalt.err (!%p954_p13)
}
  0x5e   : > { %s1035_s8 = smov 128   ;;  %s1036_s10 = smov 8  }
  0x5f   : > { %818 = dma.hbm_to_vmem [thread:$0]  (!%p1337_p7), %s1196_s9, 1024, %s1198_s11, %s1200_s29, %s1035_s8, %s1035_s8, %s1036_s10  }
  0x60   : > { %p1338_p1 = scmp.ne.s32.totalorder %s1333_s26, 0 }
  0x61   : > { %s1231_s28 = sand.u32 (!%p1338_p1), 1, %s1020_s13   ;;  %p1339_p11 = scmp.ne.s32.totalorder (!%p1338_p1), %s1330_s23, 0 }
  0x62   : > { %179 = sbr.rel (%p1338_p1) target bundleno = 581 (0x245), region = 32  ;;  %s703_s5 = sshll.u32 (!%p1338_p1), %s1231_s28, 6 }
  0x63   : > { %s182_s17 = scalar_lea.sflag (!%p1338_p1), [#allocation3], %s1231_s28  ;;  %s1235_s19 = scalar_lea.vmem (!%p1338_p1), [#allocation2], %s703_s5 }
  0x69   : > { %1003 = dma.done.wait (%p1339_p11), %s182_s17, 1024  }
  0x6a   : > { %1005 = vsyncadd (%p1339_p11), %s182_s17, 4294966272  ;;  %p1340_p7 = scmp.eq.s32.totalorder %s1083_s16, 0 }
  0x6c   : > { %1007 = dma.done.wait (%p1340_p7), [#allocation6], 192   ;;  %p1341_p3 = pmov %p1340_p7 }
  0x6d   : > { %v1037_v0 = vmov 0.0   ;;  %vm1038_vm0 = vmmov 0   ;;  %v220_v1 = vld [vmem:[%s1235_s19] sm:$0xff]  ;;  %v221_v2 = vld [vmem:[%s1235_s19 + $0x8] sm:$0xff]  ;;  %v710_v4 = vld [vmem:[%s1235_s19 + $0x10] sm:$0xff]  ;;  %vm223_vm1 = vcmask 130048  }
  0x6e   : > { %1009 = vsyncadd (%p1341_p3), [#allocation6], 4294967104  ;;  %748 = vmatprep.subr.bf16.mxu0 %v1037_v0  ;;  %750 = vmatprep.mubr.msk.bf16.mxu0 %vm1038_vm0, %v1037_v0  ;;  %v222_v3 = vpack.c.bf16 %v221_v2, %v220_v1  ;;  %v711_v5 = vld [vmem:[%s1235_s19 + $0x18] sm:$0xff]  ;;  %v217_v6 = vld [vmem:[#allocation5] sm:$0xf]  ;;  %s706_s23 = sshll.u32 %s1231_s28, 5 }
  0x6f   : > { %754 = vmatprep.subr.bf16.mxu1 %v1037_v0  ;;  %756 = vmatprep.mubr.msk.bf16.mxu1 %vm1038_vm0, %v1037_v0  ;;  %v321_v7 = vpack.c.bf16 %v711_v5, %v710_v4  ;;  %v715_v8 = vld [vmem:[%s1235_s19 + $0x20] sm:$0xff]  ;;  %v716_v9 = vld [vmem:[%s1235_s19 + $0x28] sm:$0xff]  ;;  %v720_v11 = vld [vmem:[%s1235_s19 + $0x30] sm:$0xff]  ;;  %s215_s26 = scalar_lea.vmem [#allocation8], %s706_s23  ;;  %s731_s9 = sshll.u32 %s1083_s16, 9 }
  0x70   : > { %749 = vmatpush3.bf16.msra.mxu0 %v222_v3  ;;  %v411_v10 = vpack.c.bf16 %v716_v9, %v715_v8  ;;  %v721_v12 = vld [vmem:[%s1235_s19 + $0x38] sm:$0xff]  ;;  %v871_v14 = vld [vmem:[#allocation7] sm:$0xff]   ;;  %s602_s30 = sshll.u32 %s215_s26, 4  ;;  %s1276_s20 = scalar_lea.hbm %s1323_s3, %s731_s9  ;;  %s1271_s30 = int_to_ptr.vmem [resolvable:$true] %s602_s30 }
  0x71   : > { %760 = vmatprep.subr.bf16.mxu0 %v1037_v0  ;;  %v501_v13 = vpack.c.bf16 %v721_v12, %v720_v11  ;;  %755 = vmatpush3.bf16.msra.mxu1 %v871_v14  ;;  %s589_s22 = scalar_lea.sflag [#allocation4], %s1231_s28  ;;  %s958_s27 = scalar_lea.vmem %s1271_s30, 512 }
  0x72   : > { %766 = vmatprep.subr.bf16.mxu1 %v1037_v0  ;;  %p959_p8 = scmp.ne.s32.totalorder %s1271_s30, %s958_s27  ;;  %p1342_p4 = scmp.ne.s32.totalorder %s1331_s24, 0 }
  0x73   : > { %751 = vmatmul.mubr.msk.bf16.vlgmr.msra.gmra.mrb[0].mxu0 %vm223_vm1, %v217_v6  ;;  %s1039_s16 = smov [#allocation8]  }
  0x74   : > { %761 = vmatpush3.bf16.msra.mxu0 %v321_v7  ;;  %762 = vmatprep.mubr.msk.bf16.mxu0 %vm1038_vm0, %v1037_v0  ;;  %p960_p5 = pnand %p959_p8, %p1342_p4  ;;  %s962_s4 = sshll.u32 %s1039_s16, 4  ;;  %s963_s4 = int_to_ptr.vmem [resolvable:$false] %s962_s4 }
  0x75   : > { %772 = vmatprep.subr.bf16.mxu0 %v1037_v0  ;;  %s964_s6 = scalar_lea.vmem %s963_s4, 1024  ;;  %p965_p2 = scmp.lt.s32.totalorder %s1271_s30, %s963_s4 }
  0x76   : > { %p961_p10 = pneg %p960_p5  ;;  %p966_p0 = scmp.lt.s32.totalorder %s964_s6, %s958_s27 }
  0x78   : > { %p967_p9 = por %p966_p0, %p965_p2 }
  0x7a   : > { %p968_p6 = pnand %p967_p9, %p961_p10 }
  0x7b   : > { %763 = vmatmul.mubr.msk.bf16.vlgmr.msra.gmra.mrb[4].mxu0 %vm223_vm1, %v217_v6 }
  0x7c   : > { %773 = vmatpush3.bf16.msra.mxu0 %v411_v10  ;;  %774 = vmatprep.mubr.msk.bf16.mxu0 %vm1038_vm0, %v1037_v0 }
  0x7d   : > { %784 = vmatprep.subr.bf16.mxu0 %v1037_v0 }
  0x83   : > { %775 = vmatmul.mubr.msk.bf16.vlgmr.msra.gmra.mrb[8].mxu0 %vm223_vm1, %v217_v6 }
  0x84   : > { %785 = vmatpush3.bf16.msra.mxu0 %v501_v13  ;;  %786 = vmatprep.mubr.msk.bf16.mxu0 %vm1038_vm0, %v1037_v0 }
  0x8b   : > { %787 = vmatmul.mubr.msk.bf16.vlgmr.msra.gmra.mrb[12].mxu0 %vm223_vm1, %v217_v6 }
 0x146   : > { %v261_v15 = vpop.f32.mrb[0].mxu0 }
 0x147   : > { %v267_v16 = vpack.c.bf16 %v261_v15, %v261_v15  ;;  %v752_v17 = vpop.f32.mrb[1].mxu0 }
 0x148   : > { %v264_v18 = vpop.f32.mrb[2].mxu0 }
 0x149   : > { %v753_v19 = vpop.f32.mrb[3].mxu0  ;;  %757 = vmatmul.mubr.msk.bf16.vlgmr.msra.gmra.mrb[0].mxu1 %vm223_vm1, %v267_v16 }
 0x14a   : > { %767 = vmatpush3.bf16.msra.mxu1 %v871_v14  ;;  %768 = vmatprep.mubr.msk.bf16.mxu1 %vm1038_vm0, %v1037_v0 }
 0x14b   : > { %778 = vmatprep.subr.bf16.mxu1 %v1037_v0 }
 0x14e   : > { %v356_v20 = vpop.f32.mrb[4].mxu0 }
 0x14f   : > { %v362_v21 = vpack.c.bf16 %v356_v20, %v356_v20  ;;  %v764_v22 = vpop.f32.mrb[5].mxu0 }
 0x150   : > { %v359_v23 = vpop.f32.mrb[6].mxu0 }
 0x151   : > { %v765_v24 = vpop.f32.mrb[7].mxu0  ;;  %769 = vmatmul.mubr.msk.bf16.vlgmr.msra.gmra.mrb[4].mxu1 %vm223_vm1, %v362_v21 }
 0x152   : > { %779 = vmatpush3.bf16.msra.mxu1 %v871_v14  ;;  %780 = vmatprep.mubr.msk.bf16.mxu1 %vm1038_vm0, %v1037_v0 }
 0x153   : > { %790 = vmatprep.subr.bf16.mxu1 %v1037_v0 }
 0x156   : > { %v446_v25 = vpop.f32.mrb[8].mxu0 }
 0x157   : > { %v452_v26 = vpack.c.bf16 %v446_v25, %v446_v25  ;;  %v776_v27 = vpop.f32.mrb[9].mxu0 }
 0x158   : > { %v449_v28 = vpop.f32.mrb[10].mxu0 }
 0x159   : > { %v777_v29 = vpop.f32.mrb[11].mxu0  ;;  %781 = vmatmul.mubr.msk.bf16.vlgmr.msra.gmra.mrb[8].mxu1 %vm223_vm1, %v452_v26 }
 0x15a   : > { %791 = vmatpush3.bf16.msra.mxu1 %v871_v14  ;;  %792 = vmatprep.mubr.msk.bf16.mxu1 %vm1038_vm0, %v1037_v0 }
 0x15e   : > { %v536_v30 = vpop.f32.mrb[12].mxu0 }
 0x15f   : > { %v542_v31 = vpack.c.bf16 %v536_v30, %v536_v30  ;;  %v788_v32 = vpop.f32.mrb[13].mxu0 }
 0x160   : > { %v539_v33 = vpop.f32.mrb[14].mxu0 }
 0x161   : > { %v789_v34 = vpop.f32.mrb[15].mxu0  ;;  %793 = vmatmul.mubr.msk.bf16.vlgmr.msra.gmra.mrb[12].mxu1 %vm223_vm1, %v542_v31 }
 0x21c   : > { %v311_v35 = vpop.f32.mrb[0].mxu1 }
 0x21d   : > { %317 = vst [vmem:[%s215_s26] sm:$0xff] %v311_v35  ;;  %v758_v36 = vpop.f32.mrb[1].mxu1 }
 0x21e   : > { %v314_v37 = vpop.f32.mrb[2].mxu1 }
 0x21f   : > { %v759_v38 = vpop.f32.mrb[3].mxu1 }
 0x224   : > { %v400_v39 = vpop.f32.mrb[4].mxu1 }
 0x225   : > { %714 = vst [vmem:[%s215_s26 + $0x8] sm:$0xff] %v400_v39  ;;  %v770_v40 = vpop.f32.mrb[5].mxu1 }
 0x226   : > { %v403_v41 = vpop.f32.mrb[6].mxu1 }
 0x227   : > { %v771_v42 = vpop.f32.mrb[7].mxu1 }
 0x22c   : > { %v490_v43 = vpop.f32.mrb[8].mxu1 }
 0x22d   : > { %719 = vst [vmem:[%s215_s26 + $0x10] sm:$0xff] %v490_v43  ;;  %v782_v44 = vpop.f32.mrb[9].mxu1 }
 0x22e   : > { %v493_v45 = vpop.f32.mrb[10].mxu1 }
 0x22f   : > { %v783_v46 = vpop.f32.mrb[11].mxu1 }
 0x234   : > { %v580_v47 = vpop.f32.mrb[12].mxu1 }
 0x235   : > { %724 = vst [vmem:[%s215_s26 + $0x18] sm:$0xff] %v580_v47  ;;  %v794_v48 = vpop.f32.mrb[13].mxu1 }
 0x236   : > { %v583_v49 = vpop.f32.mrb[14].mxu1 }
 0x237   : > { %971 = shalt.err (!%p968_p6)
}
 0x238   : > { %s972_s7 = scalar_lea.hbm %s1276_s20, 512  ;;  %s976_s5 = scalar_lea.hbm %s1323_s3, 1024 }
 0x239   : > { %p973_p12 = scmp.ne.s32.totalorder %s1276_s20, %s972_s7  ;;  %p977_p11 = scmp.lt.u32.totalorder %s1276_s20, %s1323_s3 }
 0x23a   : > { %p978_p7 = scmp.lt.u32.totalorder %s976_s5, %s972_s7  ;;  %p980_p8 = scmp.lt.u32.totalorder %s972_s7, %s1276_s20 }
 0x23b   : > { %p974_p13 = pnand %p973_p12, %p1342_p4 }
 0x23c   : > { %p979_p3 = por %p978_p7, %p977_p11 }
 0x23d   : > { %p975_p1 = pneg %p974_p13 }
 0x23e   : > { %p981_p5 = por %p980_p8, %p979_p3 }
 0x240   : > { %p982_p10 = pnand %p981_p5, %p975_p1 }
 0x242   : > { %985 = shalt.err (!%p982_p10)
}
 0x243   : > { %s1040_s23 = smov 128   ;;  %s1041_s26 = smov 8   ;;  %v795_v50 = vpop.f32.mrb[15].mxu1 }
 0x244   : > { %806 = dma.vmem_to_hbm [thread:$0]  (%p1342_p4), %s1271_s30, 512, %s1276_s20, %s589_s22, %s1040_s23, %s1040_s23, %s1041_s26  }
 0x245 PF: > { %s617_s9 = sand.u32 1, %s1016_s12   ;;  %p1343_p2 = scmp.ne.s32.totalorder %s1332_s25, 0 }
 0x246   : > { %p1344_p0 = scmp.ge.s32.totalorder %s1028_s15, 2  ;;  %s618_s11 = scalar_lea.sflag [#allocation4], %s617_s9 }
 0x248   : > { %p820_p9 = pnand %p1344_p0, %p1343_p2 }
 0x24a   : > { %1011 = dma.done.wait (!%p820_p9), %s618_s11, 512  }
 0x24b   : > { %1013 = vsyncadd (!%p820_p9), %s618_s11, 4294966784  ;;  %p17_p6 = scmp.ge.s32.totalorder %s1087_s18, 4   ;;  %s1345_s12 = smov %s1020_s13 }
 0x24c   : > { %s1346_s13 = smov %s1024_s14  ;;  %s1347_s14 = smov %s1099_s21 }
 0x24d   : > { %s1348_s15 = smov %s1087_s18  ;;  %19 = sbr.rel (!%p17_p6) target bundleno = 6 (0x6), region = 91 }
 0x254   :  { %623 = vsyncpa [#allocation3], 1 }
 0x255   :  { %625 = vsyncpa [#allocation3 + $0x1], 1 }
 0x256   :  { %626 = vsyncpa [#allocation6], 1 }
 0x257   :  { %627 = vsyncpa [#allocation4], 1 }
 0x258   :  { %629 = vsyncpa [#allocation4 + $0x1], 1 }

</bundles_post_ra>
